<compile_context>
chip_gen: v5e
topology: v5e:2x2
jax: 0.10.0
libtpu: 0.0.40
codegen_flags: <defaults>
</compile_context>

<pallas_src>
import jax
import jax.numpy as jnp
from jax.experimental import pallas as pl
from jax.experimental.pallas import tpu as pltpu

IMG = 26                  # spatial size -> 26*26 = 676 flattened features
FEAT = IMG * IMG          # 676
FEAT_PAD = 768            # 6 * 128, lane-dense padded feature / contraction axis
LATENT = 128


def _round_up(x, m):
    return ((x + m - 1) // m) * m


def vae_kernel(x_ref, wfused_ref, bfused_ref, wd_ref, bd_ref, eps_ref, out_ref):
    """Per-batch-tile kernel.

    x_ref      : (BT, 768)   encoder output, flattened + zero-padded 676->768, f32
    wfused_ref : (768, 256)  [wmu^T | wls^T], zero-padded rows 676->768, f32 (accuracy of exp())
    bfused_ref : (1, 256)    [bmu | bls], f32
    wd_ref     : (128, 768)  decoder-input weight, output axis zero-padded 676->768, bf16
    bd_ref     : (1, 768)    decoder-input bias, zero-padded, f32
    eps_ref    : (BT, 128)   std normal noise (host-generated, deterministic), f32
    out_ref    : (BT, 676)   decoder input z, flattened (true feature count)
    """
    # One f32 MXU pass producing [mu | log_sigma] in a single 256-wide output.
    proj = jnp.dot(x_ref[...], wfused_ref[...],
                   preferred_element_type=jnp.float32) + bfused_ref[...]   # (BT, 256) f32
    mu = proj[:, :LATENT]                                                  # 128-lane aligned slice
    sigma = jnp.exp(proj[:, LATENT:])                                      # EUP, f32

    z = mu + sigma * eps_ref[...]                                          # reparameterization, f32

    out = jnp.dot(z.astype(jnp.bfloat16), wd_ref[...],
                  preferred_element_type=jnp.float32) + bd_ref[...]        # (BT, 768) f32
    out_ref[...] = out[:, :FEAT].astype(out_ref.dtype)                     # store true 676 features


def prepare_params(params):
    """One-time weight packing: transpose, fuse mu/log_sigma, pad K and decoder-N to 768."""
    w_fused = jnp.zeros((FEAT_PAD, 2 * LATENT), jnp.float32)
    w_fused = w_fused.at[:FEAT, :LATENT].set(params["wmu"].T)
    w_fused = w_fused.at[:FEAT, LATENT:].set(params["wls"].T)
    b_fused = jnp.concatenate([params["bmu"], params["bls"]]).reshape(1, 2 * LATENT)

    wd_pad = jnp.zeros((LATENT, FEAT_PAD), jnp.float32).at[:, :FEAT].set(params["wd"].T)
    bd_pad = jnp.zeros((1, FEAT_PAD), jnp.float32).at[0, :FEAT].set(params["bd"])

    return {
        "w_fused": w_fused,                            # f32: keeps exp(log_sigma) accurate
        "b_fused": b_fused.astype(jnp.float32),
        "wd_pad": wd_pad.astype(jnp.bfloat16),
        "bd_pad": bd_pad.astype(jnp.float32),
    }


def vae_forward(x_nchw, prepped, eps, *, block_b=256):
    """x_nchw: (B, 1, 26, 26) f32 -> (B, 1, 26, 26) f32 decoder input z (E/D are identity)."""
    B = x_nchw.shape[0]
    h = x_nchw.reshape(B, FEAT)                              # E(x) identity, then flatten

    bt = min(block_b, _round_up(B, 8))                       # batch tile (multiple of 8 sublanes)
    b_pad = _round_up(B, bt)

    # Single cheap padding pass: batch -> multiple of tile, features 676 -> 768 (zeros).
    h_pad = jnp.zeros((b_pad, FEAT_PAD), jnp.float32).at[:B, :FEAT].set(h)
    eps_pad = eps if b_pad == B else jnp.zeros((b_pad, LATENT), jnp.float32).at[:B].set(eps)

    out = pl.pallas_call(
        vae_kernel,
        out_shape=jax.ShapeDtypeStruct((b_pad, FEAT), jnp.float32),
        grid=(b_pad // bt,),
        in_specs=[
            pl.BlockSpec((bt, FEAT_PAD), lambda i: (i, 0)),          # x tile
            pl.BlockSpec((FEAT_PAD, 2 * LATENT), lambda i: (0, 0)),  # fused proj weight (resident)
            pl.BlockSpec((1, 2 * LATENT), lambda i: (0, 0)),         # fused proj bias   (resident)
            pl.BlockSpec((LATENT, FEAT_PAD), lambda i: (0, 0)),      # decoder weight    (resident)
            pl.BlockSpec((1, FEAT_PAD), lambda i: (0, 0)),           # decoder bias      (resident)
            pl.BlockSpec((bt, LATENT), lambda i: (i, 0)),            # eps tile
        ],
        out_specs=pl.BlockSpec((bt, FEAT), lambda i: (i, 0)),
        compiler_params=pltpu.CompilerParams(
            dimension_semantics=("parallel",)),                      # v7x: shard batch over 2 TCs
    )(h_pad, prepped["w_fused"], prepped["b_fused"],
      prepped["wd_pad"], prepped["bd_pad"], eps_pad)

    # drop batch padding rows, then .view(batchsz, 1, 26, 26); D(z) identity
    return out[:B].reshape(B, 1, IMG, IMG)


def init_params(key):
    """Deterministic init mimicking nn.Linear default (uniform +/- 1/sqrt(fan_in))."""
    k = jax.random.split(key, 6)
    b1 = 1.0 / jnp.sqrt(FEAT)
    b2 = 1.0 / jnp.sqrt(LATENT)
    return {
        "wmu": jax.random.uniform(k[0], (LATENT, FEAT), jnp.float32, -b1, b1),
        "bmu": jax.random.uniform(k[1], (LATENT,), jnp.float32, -b1, b1),
        "wls": jax.random.uniform(k[2], (LATENT, FEAT), jnp.float32, -b1, b1),
        "bls": jax.random.uniform(k[3], (LATENT,), jnp.float32, -b1, b1),
        "wd": jax.random.uniform(k[4], (FEAT, LATENT), jnp.float32, -b2, b2),
        "bd": jax.random.uniform(k[5], (FEAT,), jnp.float32, -b2, b2),
    }


if __name__ == "__main__":
    B = 2
    root = jax.random.PRNGKey(0)
    k_param, k_x, k_eps = jax.random.split(root, 3)

    params = init_params(k_param)
    prepped = prepare_params(params)                          # one-time packing
    x = jax.random.normal(k_x, (B, 1, IMG, IMG), jnp.float32)
    eps = jax.random.normal(k_eps, (B, LATENT), jnp.float32)  # std_z ~ N(0, 1)

    fwd = jax.jit(vae_forward)
    out = fwd(x, prepped, eps)
    jax.block_until_ready(out)
    assert out.shape == (B, 1, IMG, IMG)

    # Tight check: pure-JAX reference using the same dtype recipe (f32 projection, bf16 decoder).
    h = x.reshape(B, FEAT)
    w_fused_ref = jnp.concatenate([params["wmu"].T, params["wls"].T], axis=1)
    b_fused_ref = jnp.concatenate([params["bmu"], params["bls"]])
    proj_ref = jnp.dot(h, w_fused_ref, precision=jax.lax.Precision.HIGHEST) + b_fused_ref
    mu_ref = proj_ref[:, :LATENT]
    sg_ref = jnp.exp(proj_ref[:, LATENT:])
    z_ref = mu_ref + sg_ref * eps
    out_pad_ref = jnp.dot(z_ref.astype(jnp.bfloat16), prepped["wd_pad"],
                          preferred_element_type=jnp.float32) + prepped["bd_pad"]
    ref = out_pad_ref[:, :FEAT].reshape(B, 1, IMG, IMG)
    assert jnp.allclose(out, ref, atol=2e-2, rtol=2e-2)

    # Loose sanity check against the full-precision f32 reference.
    mu_f = h @ params["wmu"].T + params["bmu"]
    sg_f = jnp.exp(h @ params["wls"].T + params["bls"])
    ref_f = ((mu_f + sg_f * eps) @ params["wd"].T + params["bd"]).reshape(B, 1, IMG, IMG)
    assert jnp.allclose(out, ref_f, atol=1e-1, rtol=1e-1)

    print("KERNEL_OK")
</pallas_src>

<mosaic_0001>
module attributes {stable_mosaic.version = 11 : i64} {
  func.func @vae_kernel(%arg0: i32, %arg1: memref<8x768xf32, #tpu.memory_space<vmem>>, %arg2: memref<768x256xf32, #tpu.memory_space<vmem>>, %arg3: memref<1x256xf32, #tpu.memory_space<vmem>>, %arg4: memref<128x768xbf16, #tpu.memory_space<vmem>>, %arg5: memref<1x768xf32, #tpu.memory_space<vmem>>, %arg6: memref<8x128xf32, #tpu.memory_space<vmem>>, %arg7: memref<8x676xf32, #tpu.memory_space<vmem>>) attributes {dimension_semantics = [#tpu.dimension_semantics<parallel>], iteration_bounds = array<i64: 1>, scalar_prefetch = 0 : i64, scratch_operands = 0 : i64, tpu.core_type = #tpu.core_type<tc>, window_params = [{transform_indices = @transform_0, window_bounds = array<i64: 8, 768>}, {pipeline_mode = #tpu.pipeline_mode<synchronous>, transform_indices = @transform_1, window_bounds = array<i64: 768, 256>}, {pipeline_mode = #tpu.pipeline_mode<synchronous>, transform_indices = @transform_2, window_bounds = array<i64: 1, 256>}, {pipeline_mode = #tpu.pipeline_mode<synchronous>, transform_indices = @transform_3, window_bounds = array<i64: 128, 768>}, {pipeline_mode = #tpu.pipeline_mode<synchronous>, transform_indices = @transform_4, window_bounds = array<i64: 1, 768>}, {transform_indices = @transform_5, window_bounds = array<i64: 8, 128>}, {transform_indices = @transform_6, window_bounds = array<i64: 8, 676>}]} {
    %c0 = arith.constant 0 : index
    %c0_0 = arith.constant 0 : index
    %0 = vector.load %arg1[%c0, %c0_0] : memref<8x768xf32, #tpu.memory_space<vmem>>, vector<8x768xf32>
    %c0_1 = arith.constant 0 : index
    %c0_2 = arith.constant 0 : index
    %1 = vector.load %arg2[%c0_1, %c0_2] : memref<768x256xf32, #tpu.memory_space<vmem>>, vector<768x256xf32>
    %cst = arith.constant dense<0.000000e+00> : vector<8x256xf32>
    %2 = tpu.matmul %0, %1, %cst {dimension_numbers = #tpu.dot_dimension_numbers<[1], [0], [0], [1], [0, 0, 1, 1], [], []>} : vector<8x768xf32>, vector<768x256xf32>, vector<8x256xf32> -> vector<8x256xf32>
    %c0_3 = arith.constant 0 : index
    %c0_4 = arith.constant 0 : index
    %3 = vector.load %arg3[%c0_3, %c0_4] : memref<1x256xf32, #tpu.memory_space<vmem>>, vector<1x256xf32>
    %4 = vector.broadcast %3 : vector<1x256xf32> to vector<8x256xf32>
    %5 = arith.addf %2, %4 : vector<8x256xf32>
    %6 = vector.extract_strided_slice %5 {offsets = [0, 0], sizes = [8, 128], strides = [1, 1]} : vector<8x256xf32> to vector<8x128xf32>
    %7 = vector.extract_strided_slice %5 {offsets = [0, 128], sizes = [8, 128], strides = [1, 1]} : vector<8x256xf32> to vector<8x128xf32>
    %8 = math.exp %7 : vector<8x128xf32>
    %c0_5 = arith.constant 0 : index
    %c0_6 = arith.constant 0 : index
    %9 = vector.load %arg6[%c0_5, %c0_6] : memref<8x128xf32, #tpu.memory_space<vmem>>, vector<8x128xf32>
    %10 = arith.mulf %8, %9 : vector<8x128xf32>
    %11 = arith.addf %6, %10 : vector<8x128xf32>
    %12 = arith.truncf %11 : vector<8x128xf32> to vector<8x128xbf16>
    %c0_7 = arith.constant 0 : index
    %c0_8 = arith.constant 0 : index
    %13 = vector.load %arg4[%c0_7, %c0_8] : memref<128x768xbf16, #tpu.memory_space<vmem>>, vector<128x768xbf16>
    %cst_9 = arith.constant dense<0.000000e+00> : vector<8x768xf32>
    %14 = tpu.matmul %12, %13, %cst_9 {dimension_numbers = #tpu.dot_dimension_numbers<[1], [0], [0], [1], [0, 0, 1, 1], [], []>} : vector<8x128xbf16>, vector<128x768xbf16>, vector<8x768xf32> -> vector<8x768xf32>
    %c0_10 = arith.constant 0 : index
    %c0_11 = arith.constant 0 : index
    %15 = vector.load %arg5[%c0_10, %c0_11] : memref<1x768xf32, #tpu.memory_space<vmem>>, vector<1x768xf32>
    %16 = vector.broadcast %15 : vector<1x768xf32> to vector<8x768xf32>
    %17 = arith.addf %14, %16 : vector<8x768xf32>
    %18 = vector.extract_strided_slice %17 {offsets = [0, 0], sizes = [8, 676], strides = [1, 1]} : vector<8x768xf32> to vector<8x676xf32>
    %c0_12 = arith.constant 0 : index
    %c0_13 = arith.constant 0 : index
    %19 = vector.load %arg7[%c0_12, %c0_13] : memref<8x676xf32, #tpu.memory_space<vmem>>, vector<8x676xf32>
    tpu.vector_store %arg7[%c0_12, %c0_13], %18 {strides = array<i32>} : memref<8x676xf32, #tpu.memory_space<vmem>>, vector<8x676xf32>,
    return
  }
  func.func @transform_0(%arg0: i32) -> (i32, i32) {
    %c0_i32 = arith.constant 0 : i32
    %c0_i32_0 = arith.constant 0 : i32
    return %arg0, %c0_i32 : i32, i32
  }
  func.func @transform_1(%arg0: i32) -> (i32, i32) {
    %c0_i32 = arith.constant 0 : i32
    %c0_i32_0 = arith.constant 0 : i32
    %c0_i32_1 = arith.constant 0 : i32
    return %c0_i32, %c0_i32_0 : i32, i32
  }
  func.func @transform_2(%arg0: i32) -> (i32, i32) {
    %c0_i32 = arith.constant 0 : i32
    %c0_i32_0 = arith.constant 0 : i32
    %c0_i32_1 = arith.constant 0 : i32
    return %c0_i32, %c0_i32_0 : i32, i32
  }
  func.func @transform_3(%arg0: i32) -> (i32, i32) {
    %c0_i32 = arith.constant 0 : i32
    %c0_i32_0 = arith.constant 0 : i32
    %c0_i32_1 = arith.constant 0 : i32
    return %c0_i32, %c0_i32_0 : i32, i32
  }
  func.func @transform_4(%arg0: i32) -> (i32, i32) {
    %c0_i32 = arith.constant 0 : i32
    %c0_i32_0 = arith.constant 0 : i32
    %c0_i32_1 = arith.constant 0 : i32
    return %c0_i32, %c0_i32_0 : i32, i32
  }
  func.func @transform_5(%arg0: i32) -> (i32, i32) {
    %c0_i32 = arith.constant 0 : i32
    %c0_i32_0 = arith.constant 0 : i32
    return %arg0, %c0_i32 : i32, i32
  }
  func.func @transform_6(%arg0: i32) -> (i32, i32) {
    %c0_i32 = arith.constant 0 : i32
    %c0_i32_0 = arith.constant 0 : i32
    return %arg0, %c0_i32 : i32, i32
  }
}

</mosaic_0001>

<bundles_post_ra>
// kernel: vae_forward.1
= control target key start
LH: loop header
LB: loop body
LE: loop exit
PB: predicated region body
PF: predicated region fallthrough
CT: control target
= control target key end

     0   :  { %11 = vsyncpa [#allocation3], 0  ;;  %s1323_s0 = inlined_call_operand.vmem [shape: f32[8,768], index: 0, kind: input, shape index: {}]   ;;  %s1324_s1 = inlined_call_operand.hbm [shape: f32[768,256], index: 1, kind: input, shape index: {}]   ;;  %s1325_s2 = inlined_call_operand.vmem [shape: f32[1,256], index: 2, kind: input, shape index: {}]   ;;  %s1326_s3 = inlined_call_operand.hbm [shape: bf16[128,768], index: 3, kind: input, shape index: {}]   ;;  %s1327_s4 = inlined_call_operand.vmem [shape: f32[1,768], index: 4, kind: input, shape index: {}]   ;;  %s1328_s5 = inlined_call_operand.vmem [shape: f32[8,128], index: 5, kind: input, shape index: {}]   ;;  %s1329_s6 = inlined_call_operand.vmem [shape: f32[8,676], index: 6, kind: output, shape index: {}]  }
   0x1   :  { %s19_s23 = sshll.u32 %s1324_s1, 4  ;;  %s20_s23 = int_to_ptr.hbm [resolvable:$true] %s19_s23 }
   0x2   :  { %12 = vsyncpa [#allocation5], 0  ;;  %s1198_s24 = smov [#allocation2]   ;;  %s34_s28 = sshll.u32 %s1326_s3, 4  ;;  %s35_s28 = int_to_ptr.hbm [resolvable:$true] %s34_s28 }
   0x3   :  { %s21_s25 = sshll.u32 %s1198_s24, 4  ;;  %s1199_s29 = smov 256   ;;  %s22_s25 = int_to_ptr.vmem [resolvable:$true] %s21_s25 }
   0x4   :  { %s1200_s30 = smov 16   ;;  %s1201_s7 = smov [#allocation4]  }
   0x5   :  { %27 = dma.hbm_to_vmem [thread:$0]  %s20_s23, 24576, %s22_s25, [#allocation3], %s1199_s29, %s1199_s29, %s1200_s30  }
   0x6   :  { %s36_s8 = sshll.u32 %s1201_s7, 4  ;;  %s1202_s9 = smov 384   ;;  %s37_s8 = int_to_ptr.vmem [resolvable:$true] %s36_s8 }
   0x7   :  { %s1203_s10 = smov 24  }
   0x8   :  { %42 = dma.hbm_to_vmem [thread:$0]  %s35_s28, 6144, %s37_s8, [#allocation5], %s1202_s9, %s1202_s9, %s1203_s10  }
   0x9   :  { %1194 = dma.done.wait [#allocation3], 24576  }
   0xa   :  { %1195 = vsyncadd [#allocation3], 4294942720 }
   0xb   :  { %1196 = dma.done.wait [#allocation5], 6144  }
   0xc   :  { %1197 = vsyncadd [#allocation5], 4294961152  ;;  %v155_v0 = vld [vmem:[#allocation2 + $0x2f0] sm:$0xff]  ;;  %v153_v2 = vld [vmem:[#allocation2 + $0x2e0] sm:$0xff]  ;;  %vm890_vm0 = vcmask 293888  }
   0xd   :  { %v91_v1 = vld [vmem:[#allocation2 + $0xf0] sm:$0xff]  ;;  %299 = vmatpush.msra.mxu2 %v155_v0  ;;  %v89_v4 = vld [vmem:[#allocation2 + $0xe0] sm:$0xff]  ;;  %v92_v62 = vld [vmem:[#allocation2 + $0xf8] sm:$0xff] }
   0xe   :  { %259 = vmatpush.msra.mxu0 %v91_v1  ;;  %v187_v3 = vld [vmem:[#allocation2 + $0x3f0] sm:$0xff]  ;;  %v185_v7 = vld [vmem:[#allocation2 + $0x3e0] sm:$0xff]  ;;  %v124_v1 = vld [vmem:[#allocation2 + $0x1f8] sm:$0xff] }
   0xf   :  { %v123_v5 = vld [vmem:[#allocation2 + $0x1f0] sm:$0xff]  ;;  %319 = vmatpush.msra.mxu3 %v187_v3  ;;  %300 = vmatpush.msra.mxu2 %v153_v2  ;;  %v121_v9 = vld [vmem:[#allocation2 + $0x1e0] sm:$0xff]  ;;  %v90_v2 = vld [vmem:[#allocation2 + $0xe8] sm:$0xff] }
  0x10   :  { %279 = vmatpush.msra.mxu1 %v123_v5  ;;  %v151_v6 = vld [vmem:[#allocation2 + $0x2d0] sm:$0xff]  ;;  %260 = vmatpush.msra.mxu0 %v89_v4  ;;  %v149_v11 = vld [vmem:[#allocation2 + $0x2c0] sm:$0xff] }
  0x11   :  { %v87_v8 = vld [vmem:[#allocation2 + $0xd0] sm:$0xff]  ;;  %320 = vmatpush.msra.mxu3 %v185_v7  ;;  %v85_v12 = vld [vmem:[#allocation2 + $0xc0] sm:$0xff]  ;;  %301 = vmatpush.msra.mxu2 %v151_v6  ;;  %v88_v6 = vld [vmem:[#allocation2 + $0xd8] sm:$0xff] }
  0x12   :  { %v183_v10 = vld [vmem:[#allocation2 + $0x3d0] sm:$0xff]  ;;  %280 = vmatpush.msra.mxu1 %v121_v9  ;;  %261 = vmatpush.msra.mxu0 %v87_v8  ;;  %v181_v14 = vld [vmem:[#allocation2 + $0x3c0] sm:$0xff]  ;;  %v122_v7 = vld [vmem:[#allocation2 + $0x1e8] sm:$0xff] }
  0x13   :  { %v119_v13 = vld [vmem:[#allocation2 + $0x1d0] sm:$0xff]  ;;  %v117_v15 = vld [vmem:[#allocation2 + $0x1c0] sm:$0xff]  ;;  %321 = vmatpush.msra.mxu3 %v183_v10  ;;  %302 = vmatpush.msra.mxu2 %v149_v11  ;;  %v86_v10 = vld [vmem:[#allocation2 + $0xc8] sm:$0xff] }
  0x14   :  { %281 = vmatpush.msra.mxu1 %v119_v13  ;;  %v147_v16 = vld [vmem:[#allocation2 + $0x2b0] sm:$0xff]  ;;  %262 = vmatpush.msra.mxu0 %v85_v12  ;;  %v145_v20 = vld [vmem:[#allocation2 + $0x2a0] sm:$0xff]  ;;  %v120_v11 = vld [vmem:[#allocation2 + $0x1d8] sm:$0xff] }
  0x15   :  { %v83_v17 = vld [vmem:[#allocation2 + $0xb0] sm:$0xff]  ;;  %322 = vmatpush.msra.mxu3 %v181_v14  ;;  %v81_v21 = vld [vmem:[#allocation2 + $0xa0] sm:$0xff]  ;;  %303 = vmatpush.msra.mxu2 %v147_v16  ;;  %v84_v14 = vld [vmem:[#allocation2 + $0xb8] sm:$0xff] }
  0x16   :  { %v179_v18 = vld [vmem:[#allocation2 + $0x3b0] sm:$0xff]  ;;  %282 = vmatpush.msra.mxu1 %v117_v15  ;;  %263 = vmatpush.msra.mxu0 %v83_v17  ;;  %v177_v22 = vld [vmem:[#allocation2 + $0x3a0] sm:$0xff]  ;;  %v118_v15 = vld [vmem:[#allocation2 + $0x1c8] sm:$0xff] }
  0x17   :  { %v115_v19 = vld [vmem:[#allocation2 + $0x1b0] sm:$0xff]  ;;  %v113_v23 = vld [vmem:[#allocation2 + $0x1a0] sm:$0xff]  ;;  %323 = vmatpush.msra.mxu3 %v179_v18  ;;  %304 = vmatpush.msra.mxu2 %v145_v20  ;;  %v82_v18 = vld [vmem:[#allocation2 + $0xa8] sm:$0xff] }
  0x18   :  { %283 = vmatpush.msra.mxu1 %v115_v19  ;;  %v143_v24 = vld [vmem:[#allocation2 + $0x290] sm:$0xff]  ;;  %264 = vmatpush.msra.mxu0 %v81_v21  ;;  %v141_v28 = vld [vmem:[#allocation2 + $0x280] sm:$0xff]  ;;  %v116_v19 = vld [vmem:[#allocation2 + $0x1b8] sm:$0xff] }
  0x19   :  { %v79_v25 = vld [vmem:[#allocation2 + $0x90] sm:$0xff]  ;;  %324 = vmatpush.msra.mxu3 %v177_v22  ;;  %v77_v29 = vld [vmem:[#allocation2 + $0x80] sm:$0xff]  ;;  %305 = vmatpush.msra.mxu2 %v143_v24  ;;  %v80_v22 = vld [vmem:[#allocation2 + $0x98] sm:$0xff] }
  0x1a   :  { %v175_v26 = vld [vmem:[#allocation2 + $0x390] sm:$0xff]  ;;  %284 = vmatpush.msra.mxu1 %v113_v23  ;;  %265 = vmatpush.msra.mxu0 %v79_v25  ;;  %v173_v30 = vld [vmem:[#allocation2 + $0x380] sm:$0xff]  ;;  %v114_v23 = vld [vmem:[#allocation2 + $0x1a8] sm:$0xff] }
  0x1b   :  { %v111_v27 = vld [vmem:[#allocation2 + $0x190] sm:$0xff]  ;;  %v109_v31 = vld [vmem:[#allocation2 + $0x180] sm:$0xff]  ;;  %325 = vmatpush.msra.mxu3 %v175_v26  ;;  %306 = vmatpush.msra.mxu2 %v141_v28  ;;  %v78_v26 = vld [vmem:[#allocation2 + $0x88] sm:$0xff] }
  0x1c   :  { %285 = vmatpush.msra.mxu1 %v111_v27  ;;  %v139_v32 = vld [vmem:[#allocation2 + $0x270] sm:$0xff]  ;;  %266 = vmatpush.msra.mxu0 %v77_v29  ;;  %v137_v36 = vld [vmem:[#allocation2 + $0x260] sm:$0xff]  ;;  %v112_v27 = vld [vmem:[#allocation2 + $0x198] sm:$0xff] }
  0x1d   :  { %v75_v33 = vld [vmem:[#allocation2 + $0x70] sm:$0xff]  ;;  %326 = vmatpush.msra.mxu3 %v173_v30  ;;  %v73_v37 = vld [vmem:[#allocation2 + $0x60] sm:$0xff]  ;;  %307 = vmatpush.msra.mxu2 %v139_v32  ;;  %v76_v30 = vld [vmem:[#allocation2 + $0x78] sm:$0xff] }
  0x1e   :  { %v171_v34 = vld [vmem:[#allocation2 + $0x370] sm:$0xff]  ;;  %286 = vmatpush.msra.mxu1 %v109_v31  ;;  %267 = vmatpush.msra.mxu0 %v75_v33  ;;  %v169_v38 = vld [vmem:[#allocation2 + $0x360] sm:$0xff]  ;;  %v110_v31 = vld [vmem:[#allocation2 + $0x188] sm:$0xff] }
  0x1f   :  { %v107_v35 = vld [vmem:[#allocation2 + $0x170] sm:$0xff]  ;;  %v105_v39 = vld [vmem:[#allocation2 + $0x160] sm:$0xff]  ;;  %327 = vmatpush.msra.mxu3 %v171_v34  ;;  %308 = vmatpush.msra.mxu2 %v137_v36  ;;  %v74_v34 = vld [vmem:[#allocation2 + $0x68] sm:$0xff] }
  0x20   :  { %287 = vmatpush.msra.mxu1 %v107_v35  ;;  %v135_v40 = vld [vmem:[#allocation2 + $0x250] sm:$0xff]  ;;  %268 = vmatpush.msra.mxu0 %v73_v37  ;;  %v133_v44 = vld [vmem:[#allocation2 + $0x240] sm:$0xff]  ;;  %v108_v35 = vld [vmem:[#allocation2 + $0x178] sm:$0xff] }
  0x21   :  { %v71_v41 = vld [vmem:[#allocation2 + $0x50] sm:$0xff]  ;;  %328 = vmatpush.msra.mxu3 %v169_v38  ;;  %v69_v45 = vld [vmem:[#allocation2 + $0x40] sm:$0xff]  ;;  %309 = vmatpush.msra.mxu2 %v135_v40  ;;  %v72_v38 = vld [vmem:[#allocation2 + $0x58] sm:$0xff] }
  0x22   :  { %v167_v42 = vld [vmem:[#allocation2 + $0x350] sm:$0xff]  ;;  %288 = vmatpush.msra.mxu1 %v105_v39  ;;  %269 = vmatpush.msra.mxu0 %v71_v41  ;;  %v165_v46 = vld [vmem:[#allocation2 + $0x340] sm:$0xff]  ;;  %v106_v39 = vld [vmem:[#allocation2 + $0x168] sm:$0xff] }
  0x23   :  { %v103_v43 = vld [vmem:[#allocation2 + $0x150] sm:$0xff]  ;;  %v101_v47 = vld [vmem:[#allocation2 + $0x140] sm:$0xff]  ;;  %329 = vmatpush.msra.mxu3 %v167_v42  ;;  %310 = vmatpush.msra.mxu2 %v133_v44  ;;  %v70_v42 = vld [vmem:[#allocation2 + $0x48] sm:$0xff] }
  0x24   :  { %289 = vmatpush.msra.mxu1 %v103_v43  ;;  %v131_v48 = vld [vmem:[#allocation2 + $0x230] sm:$0xff]  ;;  %270 = vmatpush.msra.mxu0 %v69_v45  ;;  %v129_v52 = vld [vmem:[#allocation2 + $0x220] sm:$0xff]  ;;  %v104_v43 = vld [vmem:[#allocation2 + $0x158] sm:$0xff] }
  0x25   :  { %v67_v49 = vld [vmem:[#allocation2 + $0x30] sm:$0xff]  ;;  %330 = vmatpush.msra.mxu3 %v165_v46  ;;  %v65_v53 = vld [vmem:[#allocation2 + $0x20] sm:$0xff]  ;;  %311 = vmatpush.msra.mxu2 %v131_v48  ;;  %v68_v46 = vld [vmem:[#allocation2 + $0x38] sm:$0xff] }
  0x26   :  { %v163_v50 = vld [vmem:[#allocation2 + $0x330] sm:$0xff]  ;;  %290 = vmatpush.msra.mxu1 %v101_v47  ;;  %271 = vmatpush.msra.mxu0 %v67_v49  ;;  %v161_v54 = vld [vmem:[#allocation2 + $0x320] sm:$0xff]  ;;  %v102_v47 = vld [vmem:[#allocation2 + $0x148] sm:$0xff] }
  0x27   :  { %v99_v51 = vld [vmem:[#allocation2 + $0x130] sm:$0xff]  ;;  %v97_v55 = vld [vmem:[#allocation2 + $0x120] sm:$0xff]  ;;  %331 = vmatpush.msra.mxu3 %v163_v50  ;;  %312 = vmatpush.msra.mxu2 %v129_v52  ;;  %v66_v50 = vld [vmem:[#allocation2 + $0x28] sm:$0xff] }
  0x28   :  { %291 = vmatpush.msra.mxu1 %v99_v51  ;;  %v127_v56 = vld [vmem:[#allocation2 + $0x210] sm:$0xff]  ;;  %272 = vmatpush.msra.mxu0 %v65_v53  ;;  %v125_v60 = vld [vmem:[#allocation2 + $0x200] sm:$0xff]  ;;  %v100_v51 = vld [vmem:[#allocation2 + $0x138] sm:$0xff] }
  0x29   :  { %v63_v57 = vld [vmem:[#allocation2 + $0x10] sm:$0xff]  ;;  %332 = vmatpush.msra.mxu3 %v161_v54  ;;  %v61_v61 = vld [vmem:[#allocation2] sm:$0xff]  ;;  %313 = vmatpush.msra.mxu2 %v127_v56  ;;  %v64_v54 = vld [vmem:[#allocation2 + $0x18] sm:$0xff] }
  0x2a   :  { %v159_v58 = vld [vmem:[#allocation2 + $0x310] sm:$0xff]  ;;  %292 = vmatpush.msra.mxu1 %v97_v55  ;;  %273 = vmatpush.msra.mxu0 %v63_v57  ;;  %v157_v63 = vld [vmem:[#allocation2 + $0x300] sm:$0xff]  ;;  %v98_v55 = vld [vmem:[#allocation2 + $0x128] sm:$0xff] }
  0x2b   :  { %v95_v59 = vld [vmem:[#allocation2 + $0x110] sm:$0xff]  ;;  %333 = vmatpush.msra.mxu3 %v159_v58  ;;  %314 = vmatpush.msra.mxu2 %v125_v60  ;;  %v93_v3 = vld [vmem:[#allocation2 + $0x100] sm:$0xff]  ;;  %v62_v58 = vld [vmem:[#allocation2 + $0x8] sm:$0xff] }
  0x2c   :  { %293 = vmatpush.msra.mxu1 %v95_v59  ;;  %v219_v0 = vld [vmem:[#allocation2 + $0x4f0] sm:$0xff]  ;;  %274 = vmatpush.msra.mxu0 %v61_v61  ;;  %v217_v4 = vld [vmem:[#allocation2 + $0x4e0] sm:$0xff]  ;;  %v96_v59 = vld [vmem:[#allocation2 + $0x118] sm:$0xff] }
  0x2d   :  { %379 = vmatpush.msrb.mxu2 %v92_v62  ;;  %334 = vmatpush.msra.mxu3 %v157_v63  ;;  %v251_v5 = vld [vmem:[#allocation2 + $0x5f0] sm:$0xff]  ;;  %v249_v9 = vld [vmem:[#allocation2 + $0x5e0] sm:$0xff]  ;;  %v220_v62 = vld [vmem:[#allocation2 + $0x4f8] sm:$0xff] }
  0x2e   :  { %339 = vmatpush.msrb.mxu0 %v219_v0  ;;  %294 = vmatpush.msra.mxu1 %v93_v3  ;;  %v215_v8 = vld [vmem:[#allocation2 + $0x4d0] sm:$0xff]  ;;  %v213_v12 = vld [vmem:[#allocation2 + $0x4c0] sm:$0xff]  ;;  %v94_v0 = vld [vmem:[#allocation2 + $0x108] sm:$0xff] }
  0x2f   :  { %399 = vmatpush.msrb.mxu3 %v124_v1  ;;  %380 = vmatpush.msrb.mxu2 %v90_v2  ;;  %v247_v13 = vld [vmem:[#allocation2 + $0x5d0] sm:$0xff]  ;;  %v245_v17 = vld [vmem:[#allocation2 + $0x5c0] sm:$0xff]  ;;  %v1259_v2 = vld [vmem:[%s1323_s0 + $0x18] sm:$0xff] }
  0x30   :  { %340 = vmatpush.msrb.mxu0 %v217_v4  ;;  %359 = vmatpush.msrb.mxu1 %v251_v5  ;;  %v211_v16 = vld [vmem:[#allocation2 + $0x4b0] sm:$0xff]  ;;  %v209_v20 = vld [vmem:[#allocation2 + $0x4a0] sm:$0xff]  ;;  %v156_v3 = vld [vmem:[#allocation2 + $0x2f8] sm:$0xff] }
  0x31   :  { %381 = vmatpush.msrb.mxu2 %v88_v6  ;;  %400 = vmatpush.msrb.mxu3 %v122_v7  ;;  %v243_v21 = vld [vmem:[#allocation2 + $0x5b0] sm:$0xff]  ;;  %v241_v25 = vld [vmem:[#allocation2 + $0x5a0] sm:$0xff]  ;;  %v218_v4 = vld [vmem:[#allocation2 + $0x4e8] sm:$0xff] }
  0x32   :  { %341 = vmatpush.msrb.mxu0 %v215_v8  ;;  %360 = vmatpush.msrb.mxu1 %v249_v9  ;;  %v207_v24 = vld [vmem:[#allocation2 + $0x490] sm:$0xff]  ;;  %v205_v28 = vld [vmem:[#allocation2 + $0x480] sm:$0xff]  ;;  %v252_v5 = vld [vmem:[#allocation2 + $0x5f8] sm:$0xff] }
  0x33   :  { %382 = vmatpush.msrb.mxu2 %v86_v10  ;;  %401 = vmatpush.msrb.mxu3 %v120_v11  ;;  %v239_v29 = vld [vmem:[#allocation2 + $0x590] sm:$0xff]  ;;  %v237_v33 = vld [vmem:[#allocation2 + $0x580] sm:$0xff]  ;;  %v154_v7 = vld [vmem:[#allocation2 + $0x2e8] sm:$0xff] }
  0x34   :  { %342 = vmatpush.msrb.mxu0 %v213_v12  ;;  %361 = vmatpush.msrb.mxu1 %v247_v13  ;;  %v203_v32 = vld [vmem:[#allocation2 + $0x470] sm:$0xff]  ;;  %v201_v36 = vld [vmem:[#allocation2 + $0x460] sm:$0xff]  ;;  %v1266_v8 = vld [vmem:[%s1323_s0 + $0x8] sm:$0xff] }
  0x35   :  { %383 = vmatpush.msrb.mxu2 %v84_v14  ;;  %402 = vmatpush.msrb.mxu3 %v118_v15  ;;  %v235_v37 = vld [vmem:[#allocation2 + $0x570] sm:$0xff]  ;;  %v233_v41 = vld [vmem:[#allocation2 + $0x560] sm:$0xff]  ;;  %v216_v9 = vld [vmem:[#allocation2 + $0x4d8] sm:$0xff] }
  0x36   :  { %343 = vmatpush.msrb.mxu0 %v211_v16  ;;  %362 = vmatpush.msrb.mxu1 %v245_v17  ;;  %v199_v40 = vld [vmem:[#allocation2 + $0x450] sm:$0xff]  ;;  %v197_v44 = vld [vmem:[#allocation2 + $0x440] sm:$0xff]  ;;  %v188_v10 = vld [vmem:[#allocation2 + $0x3f8] sm:$0xff] }
  0x37   :  { %384 = vmatpush.msrb.mxu2 %v82_v18  ;;  %403 = vmatpush.msrb.mxu3 %v116_v19  ;;  %v231_v45 = vld [vmem:[#allocation2 + $0x550] sm:$0xff]  ;;  %v229_v49 = vld [vmem:[#allocation2 + $0x540] sm:$0xff]  ;;  %v250_v11 = vld [vmem:[#allocation2 + $0x5e8] sm:$0xff] }
  0x38   :  { %344 = vmatpush.msrb.mxu0 %v209_v20  ;;  %363 = vmatpush.msrb.mxu1 %v243_v21  ;;  %v195_v48 = vld [vmem:[#allocation2 + $0x430] sm:$0xff]  ;;  %v193_v52 = vld [vmem:[#allocation2 + $0x420] sm:$0xff]  ;;  %v152_v12 = vld [vmem:[#allocation2 + $0x2d8] sm:$0xff] }
  0x39   :  { %385 = vmatpush.msrb.mxu2 %v80_v22  ;;  %404 = vmatpush.msrb.mxu3 %v114_v23  ;;  %v227_v53 = vld [vmem:[#allocation2 + $0x530] sm:$0xff]  ;;  %v225_v57 = vld [vmem:[#allocation2 + $0x520] sm:$0xff]  ;;  %v214_v13 = vld [vmem:[#allocation2 + $0x4c8] sm:$0xff] }
  0x3a   :  { %345 = vmatpush.msrb.mxu0 %v207_v24  ;;  %364 = vmatpush.msrb.mxu1 %v241_v25  ;;  %v191_v56 = vld [vmem:[#allocation2 + $0x410] sm:$0xff]  ;;  %v189_v61 = vld [vmem:[#allocation2 + $0x400] sm:$0xff]  ;;  %v186_v14 = vld [vmem:[#allocation2 + $0x3e8] sm:$0xff] }
  0x3b   :  { %386 = vmatpush.msrb.mxu2 %v78_v26  ;;  %405 = vmatpush.msrb.mxu3 %v112_v27  ;;  %v1248_v60 = vld [vmem:[%s1323_s0 + $0x10] sm:$0xff]  ;;  %v1253_v1 = vld [vmem:[%s1323_s0] sm:$0xff]  ;;  %v248_v15 = vld [vmem:[#allocation2 + $0x5d8] sm:$0xff] }
  0x3c   :  { %346 = vmatpush.msrb.mxu0 %v205_v28  ;;  %365 = vmatpush.msrb.mxu1 %v239_v29  ;;  %v223_v63 = vld [vmem:[#allocation2 + $0x510] sm:$0xff]  ;;  %v221_v6 = vld [vmem:[#allocation2 + $0x500] sm:$0xff]  ;;  %v150_v16 = vld [vmem:[#allocation2 + $0x2c8] sm:$0xff] }
  0x3d   :  { %387 = vmatpush.msrb.mxu2 %v76_v30  ;;  %406 = vmatpush.msrb.mxu3 %v110_v31  ;;  %v212_v17 = vld [vmem:[#allocation2 + $0x4b8] sm:$0xff]  ;;  %v246_v19 = vld [vmem:[#allocation2 + $0x5c8] sm:$0xff]  ;;  %v1272_v20 = vld [vmem:[%s1323_s0 + $0x20] sm:$0xff] }
  0x3e   :  { %347 = vmatpush.msrb.mxu0 %v203_v32  ;;  %366 = vmatpush.msrb.mxu1 %v237_v33  ;;  %v184_v18 = vld [vmem:[#allocation2 + $0x3d8] sm:$0xff]  ;;  %v210_v21 = vld [vmem:[#allocation2 + $0x4a8] sm:$0xff] }
  0x3f   :  { %388 = vmatpush.msrb.mxu2 %v74_v34  ;;  %407 = vmatpush.msrb.mxu3 %v108_v35  ;;  %v148_v22 = vld [vmem:[#allocation2 + $0x2b8] sm:$0xff]  ;;  %v182_v23 = vld [vmem:[#allocation2 + $0x3c8] sm:$0xff] }
  0x40   :  { %348 = vmatpush.msrb.mxu0 %v201_v36  ;;  %367 = vmatpush.msrb.mxu1 %v235_v37  ;;  %v244_v24 = vld [vmem:[#allocation2 + $0x5b8] sm:$0xff]  ;;  %v1277_v25 = vld [vmem:[%s1323_s0 + $0x28] sm:$0xff] }
  0x41   :  { %389 = vmatpush.msrb.mxu2 %v72_v38  ;;  %408 = vmatpush.msrb.mxu3 %v106_v39  ;;  %v146_v26 = vld [vmem:[#allocation2 + $0x2a8] sm:$0xff]  ;;  %v180_v27 = vld [vmem:[#allocation2 + $0x3b8] sm:$0xff] }
  0x42   :  { %349 = vmatpush.msrb.mxu0 %v199_v40  ;;  %368 = vmatpush.msrb.mxu1 %v233_v41  ;;  %v208_v28 = vld [vmem:[#allocation2 + $0x498] sm:$0xff]  ;;  %v242_v29 = vld [vmem:[#allocation2 + $0x5a8] sm:$0xff] }
  0x43   :  { %390 = vmatpush.msrb.mxu2 %v70_v42  ;;  %409 = vmatpush.msrb.mxu3 %v104_v43  ;;  %v144_v30 = vld [vmem:[#allocation2 + $0x298] sm:$0xff]  ;;  %v178_v31 = vld [vmem:[#allocation2 + $0x3a8] sm:$0xff] }
  0x44   :  { %350 = vmatpush.msrb.mxu0 %v197_v44  ;;  %369 = vmatpush.msrb.mxu1 %v231_v45  ;;  %v206_v32 = vld [vmem:[#allocation2 + $0x488] sm:$0xff]  ;;  %v240_v33 = vld [vmem:[#allocation2 + $0x598] sm:$0xff] }
  0x45   :  { %391 = vmatpush.msrb.mxu2 %v68_v46  ;;  %410 = vmatpush.msrb.mxu3 %v102_v47  ;;  %v142_v34 = vld [vmem:[#allocation2 + $0x288] sm:$0xff]  ;;  %v176_v35 = vld [vmem:[#allocation2 + $0x398] sm:$0xff] }
  0x46   :  { %351 = vmatpush.msrb.mxu0 %v195_v48  ;;  %370 = vmatpush.msrb.mxu1 %v229_v49  ;;  %v204_v36 = vld [vmem:[#allocation2 + $0x478] sm:$0xff]  ;;  %v238_v37 = vld [vmem:[#allocation2 + $0x588] sm:$0xff] }
  0x47   :  { %392 = vmatpush.msrb.mxu2 %v66_v50  ;;  %411 = vmatpush.msrb.mxu3 %v100_v51  ;;  %v140_v38 = vld [vmem:[#allocation2 + $0x278] sm:$0xff]  ;;  %v174_v39 = vld [vmem:[#allocation2 + $0x388] sm:$0xff] }
  0x48   :  { %352 = vmatpush.msrb.mxu0 %v193_v52  ;;  %371 = vmatpush.msrb.mxu1 %v227_v53  ;;  %v202_v40 = vld [vmem:[#allocation2 + $0x468] sm:$0xff]  ;;  %v236_v41 = vld [vmem:[#allocation2 + $0x578] sm:$0xff] }
  0x49   :  { %393 = vmatpush.msrb.mxu2 %v64_v54  ;;  %412 = vmatpush.msrb.mxu3 %v98_v55  ;;  %v138_v42 = vld [vmem:[#allocation2 + $0x268] sm:$0xff]  ;;  %v172_v43 = vld [vmem:[#allocation2 + $0x378] sm:$0xff] }
  0x4a   :  { %353 = vmatpush.msrb.mxu0 %v191_v56  ;;  %372 = vmatpush.msrb.mxu1 %v225_v57  ;;  %v200_v44 = vld [vmem:[#allocation2 + $0x458] sm:$0xff]  ;;  %v234_v45 = vld [vmem:[#allocation2 + $0x568] sm:$0xff] }
  0x4b   :  { %394 = vmatpush.msrb.mxu2 %v62_v58  ;;  %413 = vmatpush.msrb.mxu3 %v96_v59  ;;  %v136_v46 = vld [vmem:[#allocation2 + $0x258] sm:$0xff]  ;;  %v170_v47 = vld [vmem:[#allocation2 + $0x368] sm:$0xff] }
  0x4c   :  { %315 = vmatmul.f32.vlgmr.msra.gmra.mxu2 %v1248_v60  ;;  %354 = vmatpush.msrb.mxu0 %v189_v61  ;;  %v198_v48 = vld [vmem:[#allocation2 + $0x448] sm:$0xff]  ;;  %v232_v49 = vld [vmem:[#allocation2 + $0x558] sm:$0xff] }
  0x4d   :  { %459 = vmatpush.msra.mxu2 %v220_v62  ;;  %373 = vmatpush.msrb.mxu1 %v223_v63  ;;  %v134_v50 = vld [vmem:[#allocation2 + $0x248] sm:$0xff]  ;;  %v168_v51 = vld [vmem:[#allocation2 + $0x358] sm:$0xff] }
  0x4e   :  { %414 = vmatpush.msrb.mxu3 %v94_v0  ;;  %275 = vmatmul.f32.vlgmr.msra.gmra.mxu0 %v1253_v1  ;;  %v196_v52 = vld [vmem:[#allocation2 + $0x438] sm:$0xff]  ;;  %v230_v53 = vld [vmem:[#allocation2 + $0x548] sm:$0xff] }
  0x4f   :  { %335 = vmatmul.f32.vlgmr.msra.gmra.mxu3 %v1259_v2  ;;  %419 = vmatpush.msra.mxu0 %v156_v3  ;;  %v132_v54 = vld [vmem:[#allocation2 + $0x238] sm:$0xff]  ;;  %v166_v55 = vld [vmem:[#allocation2 + $0x348] sm:$0xff] }
  0x50   :  { %460 = vmatpush.msra.mxu2 %v218_v4  ;;  %479 = vmatpush.msra.mxu3 %v252_v5  ;;  %v194_v56 = vld [vmem:[#allocation2 + $0x428] sm:$0xff]  ;;  %v228_v57 = vld [vmem:[#allocation2 + $0x538] sm:$0xff] }
  0x51   :  { %374 = vmatpush.msrb.mxu1 %v221_v6  ;;  %420 = vmatpush.msra.mxu0 %v154_v7  ;;  %v130_v58 = vld [vmem:[#allocation2 + $0x228] sm:$0xff]  ;;  %v164_v59 = vld [vmem:[#allocation2 + $0x338] sm:$0xff] }
  0x52   :  { %295 = vmatmul.f32.vlgmr.msra.gmra.mxu1 %v1266_v8  ;;  %461 = vmatpush.msra.mxu2 %v216_v9  ;;  %v192_v61 = vld [vmem:[#allocation2 + $0x418] sm:$0xff]  ;;  %v226_v62 = vld [vmem:[#allocation2 + $0x528] sm:$0xff] }
  0x53   :  { %439 = vmatpush.msra.mxu1 %v188_v10  ;;  %480 = vmatpush.msra.mxu3 %v250_v11  ;;  %v128_v63 = vld [vmem:[#allocation2 + $0x218] sm:$0xff]  ;;  %v162_v0 = vld [vmem:[#allocation2 + $0x328] sm:$0xff]  ;;  %v1132_v10 = vld [vmem:[#allocation4 + $0x154] sm:$0xf] }
  0x54   :  { %421 = vmatpush.msra.mxu0 %v152_v12  ;;  %462 = vmatpush.msra.mxu2 %v214_v13  ;;  %v224_v3 = vld [vmem:[#allocation2 + $0x518] sm:$0xff]  ;;  %v126_v4 = vld [vmem:[#allocation2 + $0x208] sm:$0xff]  ;;  %v1044_v13 = vld [vmem:[#allocation4 + $0x120] sm:$0xf] }
  0x55   :  { %440 = vmatpush.msra.mxu1 %v186_v14  ;;  %481 = vmatpush.msra.mxu3 %v248_v15  ;;  %v160_v5 = vld [vmem:[#allocation2 + $0x318] sm:$0xff]  ;;  %v222_v6 = vld [vmem:[#allocation2 + $0x508] sm:$0xff] }
  0x56   :  { %422 = vmatpush.msra.mxu0 %v150_v16  ;;  %463 = vmatpush.msra.mxu2 %v212_v17  ;;  %v158_v7 = vld [vmem:[#allocation2 + $0x308] sm:$0xff]  ;;  %v1129_v14 = vld [vmem:[#allocation4 + $0x134] sm:$0xf0]  ;;  %v1126_v16 = vld [vmem:[#allocation4 + $0x124] sm:$0xf] }
  0x57   :  { %441 = vmatpush.msra.mxu1 %v184_v18  ;;  %482 = vmatpush.msra.mxu3 %v246_v19  ;;  %v1135_v9 = vld [vmem:[#allocation4 + $0x164] sm:$0xf0]  ;;  %v1070_v12 = vld [vmem:[#allocation4 + $0x168] sm:$0xf0]  ;;  %v1046_v17 = vld [vmem:[#allocation4 + $0x138] sm:$0xf0]  ;;  %v1045_v18 = vor.u32 %v1129_v14, %v1044_v13 }
  0x58   :  { %355 = vmatmul.f32.vlgmr.msrb.gmra.mxu0 %v1272_v20  ;;  %464 = vmatpush.msra.mxu2 %v210_v21  ;;  %v1073_v15 = vor.u32 %v1132_v10, %v1070_v12  ;;  %v1049_v19 = vor.u32 %v1126_v16, %v1046_v17  ;;  %v1120_v21 = vld [vmem:[#allocation4 + $0xf4] sm:$0xf]  ;;  %v900_v10 = vld [vmem:[#allocation4] sm:$0xf]  ;;  %v1090_v12 = vld [vmem:[#allocation4 + $0x4] sm:$0xf] }
  0x59   :  { %423 = vmatpush.msra.mxu0 %v148_v22  ;;  %442 = vmatpush.msra.mxu1 %v182_v23  ;;  %v1022_v22 = vld [vmem:[#allocation4 + $0x108] sm:$0xf0]  ;;  %v1076_v23 = vld [vmem:[#allocation4 + $0x158] sm:$0xf]  ;;  %v902_v14 = vld [vmem:[#allocation4 + $0x18] sm:$0xf0] }
  0x5a   :  { %483 = vmatpush.msra.mxu3 %v244_v24  ;;  %375 = vmatmul.f32.vlgmr.msrb.gmra.mxu1 %v1277_v25  ;;  %v1112_v16 = vld [vmem:[#allocation4 + $0xac] sm:$0xf0]  ;;  %v905_v17 = vor.u32 %v1090_v12, %v902_v14  ;;  %v1107_v14 = vld [vmem:[#allocation4 + $0x84] sm:$0xf0] }
  0x5b   :  { %424 = vmatpush.msra.mxu0 %v146_v26  ;;  %443 = vmatpush.msra.mxu1 %v180_v27  ;;  %v1078_v26 = vld [vmem:[#allocation4 + $0x170] sm:$0xf0] }
  0x5c   :  { %465 = vmatpush.msra.mxu2 %v208_v28  ;;  %484 = vmatpush.msra.mxu3 %v242_v29  ;;  %v1025_v29 = vor.u32 %v1120_v21, %v1022_v22  ;;  %v1137_v22 = vld [vmem:[#allocation4 + $0x174] sm:$0xf0] }
  0x5d   :  { %425 = vmatpush.msra.mxu0 %v144_v30  ;;  %444 = vmatpush.msra.mxu1 %v178_v31  ;;  %v996_v30 = vld [vmem:[#allocation4 + $0xc0] sm:$0xf]  ;;  %v1117_v31 = vld [vmem:[#allocation4 + $0xd4] sm:$0xf0] }
  0x5e   :  { %466 = vmatpush.msra.mxu2 %v206_v32  ;;  %485 = vmatpush.msra.mxu3 %v240_v33  ;;  %v1114_v32 = vld [vmem:[#allocation4 + $0xc4] sm:$0xf]  ;;  %v998_v33 = vld [vmem:[#allocation4 + $0xd8] sm:$0xf0] }
  0x5f   :  { %426 = vmatpush.msra.mxu0 %v142_v34  ;;  %445 = vmatpush.msra.mxu1 %v176_v35  ;;  %v997_v34 = vor.u32 %v1117_v31, %v996_v30  ;;  %v1001_v35 = vor.u32 %v1114_v32, %v998_v33  ;;  %v958_v30 = vld [vmem:[#allocation4 + $0x80] sm:$0xf0]  ;;  %v1060_v31 = vld [vmem:[#allocation4 + $0x130] sm:$0xf]  ;;  %v1131_v33 = vld [vmem:[#allocation4 + $0x144] sm:$0xf0] }
  0x60   :  { %467 = vmatpush.msra.mxu2 %v204_v36  ;;  %486 = vmatpush.msra.mxu3 %v238_v37  ;;  %v972_v36 = vld [vmem:[#allocation4 + $0x90] sm:$0xf]  ;;  %v1111_v37 = vld [vmem:[#allocation4 + $0xa4] sm:$0xf0] }
  0x61   :  { %427 = vmatpush.msra.mxu0 %v140_v38  ;;  %446 = vmatpush.msra.mxu1 %v174_v39  ;;  %v1108_v38 = vld [vmem:[#allocation4 + $0x94] sm:$0xf]  ;;  %v973_v39 = vor.u32 %v1111_v37, %v972_v36  ;;  %v1061_v36 = vor.u32 %v1131_v33, %v1060_v31 }
  0x62   :  { %468 = vmatpush.msra.mxu2 %v202_v40  ;;  %487 = vmatpush.msra.mxu3 %v236_v41  ;;  %v974_v40 = vld [vmem:[#allocation4 + $0xa8] sm:$0xf0]  ;;  %v1052_v41 = vld [vmem:[#allocation4 + $0x128] sm:$0xf]  ;;  %v1092_v33 = vld [vmem:[#allocation4 + $0x14] sm:$0xf] }
  0x63   :  { %428 = vmatpush.msra.mxu0 %v138_v42  ;;  %447 = vmatpush.msra.mxu1 %v172_v43  ;;  %v1130_v42 = vld [vmem:[#allocation4 + $0x13c] sm:$0xf0]  ;;  %v977_v43 = vor.u32 %v1108_v38, %v974_v40  ;;  %v1100_v40 = vld [vmem:[#allocation4 + $0x4c] sm:$0xf0] }
  0x64   :  { %469 = vmatpush.msra.mxu2 %v200_v44  ;;  %488 = vmatpush.msra.mxu3 %v234_v45  ;;  %v1053_v44 = vor.u32 %v1130_v42, %v1052_v41  ;;  %v1127_v45 = vld [vmem:[#allocation4 + $0x12c] sm:$0xf]  ;;  %v1097_v41 = vld [vmem:[#allocation4 + $0x3c] sm:$0xf] }
  0x65   :  { %429 = vmatpush.msra.mxu0 %v136_v46  ;;  %448 = vmatpush.msra.mxu1 %v170_v47  ;;  %v1054_v46 = vld [vmem:[#allocation4 + $0x140] sm:$0xf0] }
  0x66   :  { %470 = vmatpush.msra.mxu2 %v198_v48  ;;  %489 = vmatpush.msra.mxu3 %v232_v49  ;;  %v1057_v47 = vor.u32 %v1127_v45, %v1054_v46  ;;  %v948_v48 = vld [vmem:[#allocation4 + $0x60] sm:$0xf]  ;;  %v1105_v49 = vld [vmem:[#allocation4 + $0x74] sm:$0xf0] }
  0x67   :  { %395 = vmatmul.f32.vlgmr.msrb.gmra.mxu2 %v1253_v1  ;;  %430 = vmatpush.msra.mxu0 %v134_v50  ;;  %v190_v1 = vld [vmem:[#allocation2 + $0x408] sm:$0xff]  ;;  %v1102_v50 = vld [vmem:[#allocation4 + $0x64] sm:$0xf]  ;;  %v1125_v45 = vld [vmem:[#allocation4 + $0x114] sm:$0xf0] }
  0x68   :  { %449 = vmatpush.msra.mxu1 %v168_v51  ;;  %471 = vmatpush.msra.mxu2 %v196_v52  ;;  %v949_v51 = vor.u32 %v1105_v49, %v948_v48  ;;  %v950_v52 = vld [vmem:[#allocation4 + $0x78] sm:$0xf0]  ;;  %v1122_v49 = vld [vmem:[#allocation4 + $0x104] sm:$0xf] }
  0x69   :  { %490 = vmatpush.msra.mxu3 %v230_v53  ;;  %431 = vmatpush.msra.mxu0 %v132_v54  ;;  %v1028_v53 = vld [vmem:[#allocation4 + $0xf8] sm:$0xf]  ;;  %v1124_v54 = vld [vmem:[#allocation4 + $0x10c] sm:$0xf0] }
  0x6a   :  { %415 = vmatmul.f32.vlgmr.msrb.gmra.mxu3 %v1266_v8  ;;  %450 = vmatpush.msra.mxu1 %v166_v55  ;;  %v1068_v8 = vld [vmem:[#allocation4 + $0x150] sm:$0xf]  ;;  %v953_v55 = vor.u32 %v1102_v50, %v950_v52  ;;  %v1038_v50 = vld [vmem:[#allocation4 + $0x118] sm:$0xf0]  ;;  %v908_v52 = vld [vmem:[#allocation4 + $0x8] sm:$0xf] }
  0x6b   :  { %472 = vmatpush.msra.mxu2 %v194_v56  ;;  %491 = vmatpush.msra.mxu3 %v228_v57  ;;  %v1069_v11 = vor.u32 %v1135_v9, %v1068_v8  ;;  %v1029_v56 = vor.u32 %v1124_v54, %v1028_v53  ;;  %v1121_v57 = vld [vmem:[#allocation4 + $0xfc] sm:$0xf]  ;;  %v1006_v8 = vld [vmem:[#allocation4 + $0xe0] sm:$0xf0]  ;;  %v1094_v53 = vld [vmem:[#allocation4 + $0x1c] sm:$0xf0] }
  0x6c   :  { %432 = vmatpush.msra.mxu0 %v130_v58  ;;  %451 = vmatpush.msra.mxu1 %v164_v59  ;;  %v1030_v58 = vld [vmem:[#allocation4 + $0x110] sm:$0xf0]  ;;  %v1091_v54 = vld [vmem:[#allocation4 + $0xc] sm:$0xf] }
  0x6d   :  { %473 = vmatpush.msra.mxu2 %v192_v61  ;;  %492 = vmatpush.msra.mxu3 %v226_v62  ;;  %v1033_v59 = vor.u32 %v1121_v57, %v1030_v58  ;;  %v924_v61 = vld [vmem:[#allocation4 + $0x30] sm:$0xf]  ;;  %v1099_v62 = vld [vmem:[#allocation4 + $0x44] sm:$0xf0]  ;;  %v910_v57 = vld [vmem:[#allocation4 + $0x20] sm:$0xf0] }
  0x6e   :  { %433 = vmatpush.msra.mxu0 %v128_v63  ;;  %452 = vmatpush.msra.mxu1 %v162_v0  ;;  %v1096_v63 = vld [vmem:[#allocation4 + $0x34] sm:$0xf]  ;;  %v925_v0 = vor.u32 %v1099_v62, %v924_v61  ;;  %v1012_v58 = vld [vmem:[#allocation4 + $0xd0] sm:$0xf]  ;;  %v913_v61 = vor.u32 %v1091_v54, %v910_v57 }
  0x6f   :  { %474 = vmatpush.msra.mxu2 %v190_v1  ;;  %493 = vmatpush.msra.mxu3 %v224_v3  ;;  %v926_v1 = vld [vmem:[#allocation4 + $0x48] sm:$0xf0]  ;;  %v1004_v3 = vld [vmem:[#allocation4 + $0xc8] sm:$0xf] }
  0x70   :  { %475 = vmatmul.f32.vlgmr.msra.gmra.mxu2 %v1272_v20  ;;  %434 = vmatpush.msra.mxu0 %v126_v4  ;;  %v1123_v20 = vld [vmem:[#allocation4 + $0x104] sm:$0xf0]  ;;  %v1118_v4 = vld [vmem:[#allocation4 + $0xdc] sm:$0xf0] }
  0x71   :  { %453 = vmatpush.msra.mxu1 %v160_v5  ;;  %494 = vmatpush.msra.mxu3 %v222_v6  ;;  %v929_v5 = vor.u32 %v1096_v63, %v926_v1  ;;  %v1005_v6 = vor.u32 %v1118_v4, %v1004_v3  ;;  %v1116_v63 = vld [vmem:[#allocation4 + $0xd4] sm:$0xf]  ;;  %v253_v3 = vld [vmem:[%s1325_s2] sm:$0x3] }
  0x72   :  { %435 = vmatmul.f32.vlgmr.msra.gmra.mxu0 %v1248_v60  ;;  %495 = vmatmul.f32.vlgmr.msra.gmra.mxu3 %v1277_v25  ;;  %v1020_v60 = vld [vmem:[#allocation4 + $0xf0] sm:$0xf]  ;;  %v1133_v25 = vld [vmem:[#allocation4 + $0x15c] sm:$0xf] }
  0x73   :  { %454 = vmatpush.msra.mxu1 %v158_v7  ;;  %807 = vmatpush.bf16.msrb.mxu0 %v1069_v11  ;;  %v1021_v27 = vor.u32 %v1123_v20, %v1020_v60  ;;  %v1081_v28 = vor.u32 %v1133_v25, %v1078_v26  ;;  %v1115_v7 = vld [vmem:[#allocation4 + $0xcc] sm:$0xf]  ;;  %v1093_v11 = vld [vmem:[#allocation4 + $0x14] sm:$0xf0]  ;;  %v982_v60 = vld [vmem:[#allocation4 + $0xb0] sm:$0xf0] }
  0x74   :  { %455 = vmatmul.f32.vlgmr.msra.gmra.mxu1 %v1259_v2  ;;  %v1136_v2 = vld [vmem:[#allocation4 + $0x16c] sm:$0xf0]  ;;  %v1009_v9 = vor.u32 %v1115_v7, %v1006_v8  ;;  %v901_v13 = vor.u32 %v1093_v11, %v900_v10  ;;  %v1084_v20 = vld [vmem:[#allocation4 + $0x160] sm:$0xf]  ;;  %v956_v26 = vld [vmem:[#allocation4 + $0x68] sm:$0xf] }
  0x75   :  { %820 = vmatpush.bf16.msrb.mxu1 %v1073_v15  ;;  %v1077_v24 = vor.u32 %v1136_v2, %v1076_v23  ;;  %846 = vmatpush.bf16.msrb.mxu3 %v1081_v28  ;;  %v980_v15 = vld [vmem:[#allocation4 + $0x98] sm:$0xf]  ;;  %v1134_v23 = vld [vmem:[#allocation4 + $0x164] sm:$0xf]  ;;  %v1086_v2 = vld [vmem:[#allocation4 + $0x178] sm:$0xf0] }
  0x76   :  { %v1089_v25 = vor.u32 %v1134_v23, %v1086_v2  ;;  %v1103_v28 = vld [vmem:[#allocation4 + $0x6c] sm:$0xf]  ;;  %v1110_v7 = vld [vmem:[#allocation4 + $0xa4] sm:$0xf]  ;;  %v990_v11 = vld [vmem:[#allocation4 + $0xb8] sm:$0xf0] }
  0x77   :  { %808 = vmatpush.bf16.msrb.mxu0 %v1045_v18  ;;  %833 = vmatpush.bf16.msrb.mxu2 %v1077_v24  ;;  %v981_v18 = vor.u32 %v1112_v16, %v980_v15  ;;  %v1085_v24 = vor.u32 %v1137_v22, %v1084_v20  ;;  %v961_v32 = vor.u32 %v1103_v28, %v958_v30  ;;  %v1104_v15 = vld [vmem:[#allocation4 + $0x74] sm:$0xf]  ;;  %v255_v16 = vperm.slane %v253_v3, 0  ;;  %v1101_v23 = vld [vmem:[#allocation4 + $0x54] sm:$0xf0] }
  0x78   :  { %v993_v12 = vor.u32 %v1110_v7, %v990_v11  ;;  %v1098_v2 = vld [vmem:[#allocation4 + $0x44] sm:$0xf]  ;;  %v916_v30 = vld [vmem:[#allocation4 + $0x10] sm:$0xf] }
  0x79   :  { %821 = vmatpush.bf16.msrb.mxu1 %v1049_v19  ;;  %847 = vmatpush.bf16.msrb.mxu3 %v1057_v47  ;;  %v1109_v19 = vld [vmem:[#allocation4 + $0x9c] sm:$0xf] }
  0x7a   :  { %v985_v21 = vor.u32 %v1109_v19, %v982_v60 }
  0x7b   :  { %809 = vmatpush.bf16.msrb.mxu0 %v1021_v27  ;;  %834 = vmatpush.bf16.msrb.mxu2 %v1053_v44  ;;  %v1106_v27 = vld [vmem:[#allocation4 + $0x7c] sm:$0xf0] }
  0x7c   :  { %v1036_v44 = vld [vmem:[#allocation4 + $0x100] sm:$0xf] }
  0x7d   :  { %822 = vmatpush.bf16.msrb.mxu1 %v1025_v29  ;;  %848 = vmatpush.bf16.msrb.mxu3 %v1033_v59  ;;  %v957_v29 = vor.u32 %v1106_v27, %v956_v26  ;;  %v1037_v48 = vor.u32 %v1125_v45, %v1036_v44  ;;  %v1119_v59 = vld [vmem:[#allocation4 + $0xe4] sm:$0xf0] }
  0x7e   :  { %v1013_v62 = vor.u32 %v1119_v59, %v1012_v58 }
  0x7f   :  { %810 = vmatpush.bf16.msrb.mxu0 %v997_v34  ;;  %835 = vmatpush.bf16.msrb.mxu2 %v1029_v56  ;;  %v1128_v34 = vld [vmem:[#allocation4 + $0x134] sm:$0xf]  ;;  %v909_v56 = vor.u32 %v1094_v53, %v908_v52 }
  0x81   :  { %823 = vmatpush.bf16.msrb.mxu1 %v1001_v35  ;;  %849 = vmatpush.bf16.msrb.mxu3 %v1009_v9  ;;  %v1062_v35 = vld [vmem:[#allocation4 + $0x148] sm:$0xf0]  ;;  %v256_v9 = vperm.slane %v253_v3, 1 }
  0x82   :  { %v1065_v37 = vor.u32 %v1128_v34, %v1062_v35  ;;  %v918_v34 = vld [vmem:[#allocation4 + $0x28] sm:$0xf0] }
  0x83   :  { %811 = vmatpush.bf16.msrb.mxu0 %v973_v39  ;;  %836 = vmatpush.bf16.msrb.mxu2 %v1005_v6  ;;  %v932_v39 = vld [vmem:[#allocation4 + $0x38] sm:$0xf] }
  0x84   :  { %v933_v42 = vor.u32 %v1100_v40, %v932_v39  ;;  %v1113_v6 = vld [vmem:[#allocation4 + $0xb4] sm:$0xf0] }
  0x85   :  { %824 = vmatpush.bf16.msrb.mxu1 %v977_v43  ;;  %850 = vmatpush.bf16.msrb.mxu3 %v985_v21  ;;  %v934_v43 = vld [vmem:[#allocation4 + $0x50] sm:$0xf0]  ;;  %v940_v21 = vld [vmem:[#allocation4 + $0x40] sm:$0xf] }
  0x86   :  { %v937_v47 = vor.u32 %v1097_v41, %v934_v43  ;;  %v941_v28 = vor.u32 %v1101_v23, %v940_v21 }
  0x87   :  { %812 = vmatpush.bf16.msrb.mxu0 %v949_v51  ;;  %837 = vmatpush.bf16.msrb.mxu2 %v981_v18  ;;  %v1041_v51 = vor.u32 %v1122_v49, %v1038_v50  ;;  %v966_v18 = vld [vmem:[#allocation4 + $0x88] sm:$0xf0] }
  0x88   :  { %v969_v20 = vor.u32 %v1104_v15, %v966_v18 }
  0x89   :  { %825 = vmatpush.bf16.msrb.mxu1 %v953_v55  ;;  %851 = vmatpush.bf16.msrb.mxu3 %v961_v32  ;;  %v1095_v32 = vld [vmem:[#allocation4 + $0x24] sm:$0xf0] }
  0x8a   :  { %v917_v40 = vor.u32 %v1095_v32, %v916_v30 }
  0x8b   :  { %813 = vmatpush.bf16.msrb.mxu0 %v925_v0  ;;  %838 = vmatpush.bf16.msrb.mxu2 %v957_v29  ;;  %v1014_v0 = vld [vmem:[#allocation4 + $0xe8] sm:$0xf0] }
  0x8c   :  { %v1017_v1 = vor.u32 %v1116_v63, %v1014_v0 }
  0x8d   :  { %826 = vmatpush.bf16.msrb.mxu1 %v929_v5  ;;  %852 = vmatpush.bf16.msrb.mxu3 %v937_v47  ;;  %v988_v5 = vld [vmem:[#allocation4 + $0xa0] sm:$0xf] }
  0x8e   :  { %v989_v10 = vor.u32 %v1113_v6, %v988_v5 }
  0x8f   :  { %814 = vmatpush.bf16.msrb.mxu0 %v901_v13  ;;  %839 = vmatpush.bf16.msrb.mxu2 %v933_v42  ;;  %v964_v13 = vld [vmem:[#allocation4 + $0x70] sm:$0xf] }
  0x90   :  { %v965_v60 = vor.u32 %v1107_v14, %v964_v13 }
  0x91   :  { %827 = vmatpush.bf16.msrb.mxu1 %v905_v17  ;;  %853 = vmatpush.bf16.msrb.mxu3 %v913_v61 }
  0x93   :  { %859 = vmatpush.bf16.msra.mxu0 %v1085_v24  ;;  %840 = vmatpush.bf16.msrb.mxu2 %v909_v56  ;;  %v942_v24 = vld [vmem:[#allocation4 + $0x58] sm:$0xf0] }
  0x94   :  { %v945_v29 = vor.u32 %v1098_v2, %v942_v24 }
  0x95   :  { %872 = vmatpush.bf16.msra.mxu1 %v1089_v25 }
  0x97   :  { %860 = vmatpush.bf16.msra.mxu0 %v1061_v36 }
  0x99   :  { %873 = vmatpush.bf16.msra.mxu1 %v1065_v37 }
  0x9b   :  { %861 = vmatpush.bf16.msra.mxu0 %v1037_v48 }
  0x9d   :  { %874 = vmatpush.bf16.msra.mxu1 %v1041_v51 }
  0x9f   :  { %862 = vmatpush.bf16.msra.mxu0 %v1013_v62 }
  0xa1   :  { %875 = vmatpush.bf16.msra.mxu1 %v1017_v1 }
  0xa3   :  { %863 = vmatpush.bf16.msra.mxu0 %v989_v10 }
  0xa5   :  { %876 = vmatpush.bf16.msra.mxu1 %v993_v12 }
  0xa7   :  { %864 = vmatpush.bf16.msra.mxu0 %v965_v60 }
  0xa9   :  { %877 = vmatpush.bf16.msra.mxu1 %v969_v20 }
  0xab   :  { %865 = vmatpush.bf16.msra.mxu0 %v941_v28 }
  0xad   :  { %878 = vmatpush.bf16.msra.mxu1 %v945_v29 }
  0xaf   :  { %866 = vmatpush.bf16.msra.mxu0 %v917_v40 }
  0xcb   :  { %v1287_v38 = vpop.f32.mrf.mxu0 }
  0xcc   :  { %v277_v25 = vadd.f32 %v1287_v38, %v255_v16  ;;  %v921_v38 = vor.u32 %v1092_v33, %v918_v34 }
  0xce   :  { %879 = vmatpush.bf16.msra.mxu1 %v921_v38 }
  0xcf   :  { %v1289_v46 = vpop.f32.mrf.mxu1  ;;  %v1291_v55 = vpop.f32.mrf.mxu2 }
  0xd0   :  { %v297_v36 = vadd.f32 %v1289_v46, %v277_v25  ;;  %v501_v46 = vld [vmem:[%s1328_s5] sm:$0xff] }
  0xd2   :  { %v336_v4 = vpop.f32.mrf.mxu3  ;;  %v317_v43 = vadd.f32 %v1291_v55, %v297_v36  ;;  %v553_v55 = vld [vmem:[%s1327_s4] sm:$0x3f] }
  0xd3   :  { %v555_v56 = vperm.slane %v553_v55, 0  ;;  %v556_v57 = vperm.slane %v553_v55, 1  ;;  %v557_v63 = vperm.slane %v553_v55, 2  ;;  %v558_v0 = vperm.slane %v553_v55, 3 }
  0xd4   :  { %v337_v48 = vadd.f32 %v336_v4, %v317_v43 }
  0xd5   :  { %v356_v8 = vpop.f32.mrf.mxu0 }
  0xd6   :  { %v357_v49 = vadd.f32 %v356_v8, %v337_v48  ;;  %v559_v8 = vperm.slane %v553_v55, 4 }
  0xd7   :  { %v376_v17 = vpop.f32.mrf.mxu1 }
  0xd8   :  { %v377_v51 = vadd.f32 %v376_v17, %v357_v49 }
  0xea   :  { %v396_v19 = vpop.f32.mrf.mxu2 }
  0xeb   :  { %v397_v22 = vadd.f32 %v396_v19, %v256_v9  ;;  %v560_v9 = vperm.slane %v553_v55, 5 }
  0xed   :  { %v416_v26 = vpop.f32.mrf.mxu3 }
  0xee   :  { %v417_v27 = vadd.f32 %v416_v26, %v397_v22 }
  0xef   :  { %v436_v31 = vpop.f32.mrf.mxu0 }
  0xf0   :  { %v437_v35 = vadd.f32 %v436_v31, %v417_v27 }
  0xf1   :  { %v456_v37 = vpop.f32.mrf.mxu1 }
  0xf2   :  { %v457_v39 = vadd.f32 %v456_v37, %v437_v35 }
  0xf3   :  { %v476_v41 = vpop.f32.mrf.mxu2 }
  0xf4   :  { %v477_v42 = vadd.f32 %v476_v41, %v457_v39 }
  0xf5   :  { %v496_v44 = vpop.f32.mrf.mxu3 }
  0xf6   :  { %v497_v45 = vadd.f32 %v496_v44, %v477_v42 }
  0xf8   :  { %v499_v47 = vmul.f32 1.442695, %v497_v45 }
  0xfa   :  { %1144 = vpow2.f32 %v499_v47 }
 0x100   :  { %v1145_v50 = vpop.eup %1144 }
 0x101   :  { %v502_v52 = vmul.f32 %v1145_v50, %v501_v46 }
 0x103   :  { %v503_v53 = vadd.f32 %v502_v52, %v377_v51 }
 0x105   :  { %v504_v54 = vpack.c.bf16 %v503_v53, %v503_v53 }
 0x107   :  { %815 = vmatmul.bf16.vlgmr.msrb.gmra.mxu0 %v504_v54  ;;  %828 = vmatmul.bf16.vlgmr.msrb.gmra.mxu1 %v504_v54 }
 0x108   :  { %841 = vmatmul.bf16.vlgmr.msrb.gmra.mxu2 %v504_v54  ;;  %854 = vmatmul.bf16.vlgmr.msrb.gmra.mxu3 %v504_v54 }
 0x117   :  { %867 = vmatmul.bf16.vlgmr.msra.gmra.mxu0 %v504_v54  ;;  %880 = vmatmul.bf16.vlgmr.msra.gmra.mxu1 %v504_v54 }
 0x184   :  { %v816_v58 = vpop.f32.mrf.mxu0  ;;  %v829_v59 = vpop.f32.mrf.mxu1 }
 0x185   :  { %v817_v61 = vadd.f32 %v816_v58, %v555_v56  ;;  %v830_v62 = vadd.f32 %v829_v59, %v556_v57 }
 0x187   :  { %885 = vst [vmem:[%s1329_s6] sm:$0xff] %v817_v61 }
 0x188   :  { %886 = vst [vmem:[%s1329_s6 + $0x8] sm:$0xff] %v830_v62 }
 0x18b   :  { %v842_v1 = vpop.f32.mrf.mxu2  ;;  %v855_v3 = vpop.f32.mrf.mxu3 }
 0x18c   :  { %v843_v4 = vadd.f32 %v842_v1, %v557_v63  ;;  %v856_v5 = vadd.f32 %v855_v3, %v558_v0  ;;  %v818_v6 = vpop.f32.mrf.mxu0  ;;  %v831_v7 = vpop.f32.mrf.mxu1 }
 0x18e   :  { %887 = vst [vmem:[%s1329_s6 + $0x10] sm:$0xff] %v843_v4 }
 0x18f   :  { %888 = vst [vmem:[%s1329_s6 + $0x18] sm:$0xff] %v856_v5 }
 0x193   :  { %v844_v10 = vpop.f32.mrf.mxu2  ;;  %v857_v11 = vpop.f32.mrf.mxu3 }
 0x194   :  { %v868_v12 = vpop.f32.mrf.mxu0  ;;  %v881_v13 = vpop.f32.mrf.mxu1 }
 0x195   :  { %v869_v14 = vadd.f32 %v868_v12, %v559_v8  ;;  %v882_v15 = vadd.f32 %v881_v13, %v560_v9 }
 0x197   :  { %889 = vst [vmem:[%s1329_s6 + $0x20] sm:$0xff] %v869_v14 }
 0x198   :  { %891 = vst.msk [vmem:[%s1329_s6 + $0x28] sm:$0xff] %vm890_vm0, %v882_v15 }
 0x19c   :  { %v870_v16 = vpop.f32.mrf.mxu0  ;;  %v883_v17 = vpop.f32.mrf.mxu1 }
 0x19d   :  { %896 = vsyncpa [#allocation3], 1 }
 0x19e   :  { %897 = vsyncpa [#allocation5], 1 }

</bundles_post_ra>
